<compile_context>
chip_gen: v5e
topology: v5e:2x2
jax: 0.10.0
libtpu: 0.0.40
codegen_flags: <defaults>
</compile_context>

<pallas_src>
import numpy as np
import jax
import jax.numpy as jnp
from jax.experimental import pallas as pl
from jax.experimental.pallas import tpu as pltpu


def _round_up(x, m):
    return ((x + m - 1) // m) * m


# --------------------------------------------------------------------------
# Parameter construction (deterministic, mirrors torchaudio's definitions)
# --------------------------------------------------------------------------
def melscale_fbanks(n_freqs, n_mels, sample_rate):
    """torchaudio melscale_fbanks (htk scale, norm=None) -> (n_freqs, n_mels)."""
    f_min, f_max = 0.0, sample_rate / 2.0

    def hz_to_mel(f):
        return 2595.0 * np.log10(1.0 + f / 700.0)

    def mel_to_hz(m):
        return 700.0 * (10.0 ** (m / 2595.0) - 1.0)

    all_freqs = np.linspace(0.0, sample_rate // 2, n_freqs)
    m_pts = np.linspace(hz_to_mel(f_min), hz_to_mel(f_max), n_mels + 2)
    f_pts = mel_to_hz(m_pts)
    f_diff = f_pts[1:] - f_pts[:-1]                      # (n_mels+1,)
    slopes = f_pts[None, :] - all_freqs[:, None]         # (n_freqs, n_mels+2)
    down = -slopes[:, :-2] / f_diff[:-1]
    up = slopes[:, 2:] / f_diff[1:]
    return np.maximum(0.0, np.minimum(down, up)).astype(np.float32)


def build_logmel_params(cfg):
    """Packed, window-folded rDFT matrix + packed-layout mel filterbank."""
    n_fft = cfg["n_fft"]
    win_len = cfg["win_len"]
    n_mels = cfg["n_mels"]
    fs = cfg["fs"]
    assert n_fft % 2 == 0, "n_fft must be even"
    assert win_len <= n_fft

    n_freqs = n_fft // 2 + 1
    n_pack_used = 2 * n_freqs - 2                        # == n_fft
    n_fft_in = _round_up(n_fft, 128)                     # contraction dim (lane pad)
    n_pack = _round_up(n_pack_used, 128)                 # packed re|im width (lane pad)
    n_mels_pad = _round_up(n_mels, 128)                  # lane-dense output

    # periodic Hann window, zero-padded and centered to n_fft (torch.stft behavior)
    win = np.zeros(n_fft, np.float32)
    left = (n_fft - win_len) // 2
    n = np.arange(win_len)
    win[left:left + win_len] = 0.5 * (1.0 - np.cos(2.0 * np.pi * n / win_len))

    # packed windowed rDFT matrix: columns [re_0..re_{N/2} | im_1..im_{N/2-1}]
    # (im_0 and im_{N/2} are exactly zero for real input, so they are dropped)
    nn = np.arange(n_fft)[:, None]
    k = np.arange(n_freqs)[None, :]
    ang = 2.0 * np.pi * nn * k / n_fft
    dft = np.zeros((n_fft_in, n_pack), np.float32)
    dft[:n_fft, :n_freqs] = np.cos(ang) * win[:, None]
    dft[:n_fft, n_freqs:n_pack_used] = (-np.sin(ang[:, 1:n_freqs - 1])) * win[:, None]

    # mel filterbank re-indexed to the packed power layout, lane-padded to 128 mels
    fb = melscale_fbanks(n_freqs, n_mels, fs)            # (n_freqs, n_mels)
    fb_packed = np.zeros((n_pack, n_mels_pad), np.float32)
    fb_packed[:n_freqs, :n_mels] = fb                    # re_k^2 -> freq k
    fb_packed[n_freqs:n_pack_used, :n_mels] = fb[1:n_freqs - 1, :]   # im_k^2 -> freq k

    return jnp.asarray(dft), jnp.asarray(fb_packed)


# --------------------------------------------------------------------------
# Pallas kernel: per row tile, windowed rDFT (packed) -> power -> mel -> dB
# --------------------------------------------------------------------------
def logmel_kernel(frames_ref, dft_ref, fb_ref, out_ref):
    # single packed DFT matmul (window already folded into dft)
    y = jnp.dot(frames_ref[...], dft_ref[...], preferred_element_type=jnp.float32)
    p = y * y                                            # packed power spectrum
    mel = jnp.dot(p, fb_ref[...], preferred_element_type=jnp.float32)
    out_ref[...] = 10.0 * jnp.log10(jnp.maximum(mel, 1e-10))   # AmplitudeToDB(power)


def logmelspec_pallas(x, cfg, params, tm_max=512):
    """x: (B, time) float32 -> (B, n_mels, T) float32 (torchaudio layout)."""
    n_fft = cfg["n_fft"]
    hop = cfg["hop_len"]
    n_mels = cfg["n_mels"]
    dft_packed, fb_packed = params
    n_fft_in = dft_packed.shape[0]
    n_pack = dft_packed.shape[1]
    n_mels_pad = fb_packed.shape[1]

    B, time = x.shape
    # center=True reflect padding, then frame (pure JAX glue)
    pad = n_fft // 2
    xp = jnp.pad(x, ((0, 0), (pad, pad)), mode="reflect")
    T = 1 + time // hop
    idx = np.arange(T)[:, None] * hop + np.arange(n_fft)[None, :]
    frames = xp[:, idx].reshape(B * T, n_fft)            # (B*T, n_fft)

    rows = B * T
    # large row tile (multiple of 8) to fill the MXU; tiny inputs get one
    # right-sized tile. tm_max=512 keeps double-buffered VMEM < ~3 MiB on all gens.
    tm = min(tm_max, _round_up(rows, 8))
    rows_pad = _round_up(rows, tm)
    frames = jnp.pad(frames, ((0, rows_pad - rows), (0, n_fft_in - n_fft)))

    grid = (rows_pad // tm,)
    out = pl.pallas_call(
        logmel_kernel,
        out_shape=jax.ShapeDtypeStruct((rows_pad, n_mels_pad), jnp.float32),
        grid_spec=pltpu.PrefetchScalarGridSpec(
            num_scalar_prefetch=0,
            grid=grid,
            in_specs=[
                pl.BlockSpec((tm, n_fft_in), lambda i: (i, 0)),
                pl.BlockSpec((n_fft_in, n_pack), lambda i: (0, 0)),
                pl.BlockSpec((n_pack, n_mels_pad), lambda i: (0, 0)),
            ],
            out_specs=pl.BlockSpec((tm, n_mels_pad), lambda i: (i, 0)),
        ),
        compiler_params=pltpu.CompilerParams(
            dimension_semantics=("parallel",)),
    )(frames, dft_packed, fb_packed)

    out = out[:rows, :n_mels].reshape(B, T, n_mels)
    return jnp.transpose(out, (0, 2, 1))                 # (B, n_mels, T)


class GPUTransformSamplesPallas:
    """JAX/Pallas port of GPUTransformSamples."""

    def __init__(self, cfg, train=True, cpu=False):
        self.cfg = cfg
        self.train = train
        self.cpu = cpu
        self.n_frames = cfg["n_frames"]
        self.overlap = cfg["overlap"]
        # TODO(synk): Reverb/Chorus/Pedalboard are built in the PyTorch __init__
        # but never used in forward(); not implemented.
        self.params = build_logmel_params(cfg)

    def __call__(self, x_i, x_j):
        if self.cpu:
            return x_i, x_j
        if self.train:
            X_i = logmelspec_pallas(x_i, self.cfg, self.params)
            X_j = logmelspec_pallas(x_j, self.cfg, self.params)
            return X_i, X_j
        # eval path: logmelspec on a single clip, then unfold into overlapping
        # n_frames windows along time.
        X_i = logmelspec_pallas(x_i.reshape(1, -1), self.cfg, self.params)[0].T  # (T, n_mels)
        step = int(self.n_frames * (1 - self.overlap))
        n_win = (X_i.shape[0] - self.n_frames) // step + 1
        widx = np.arange(n_win)[:, None] * step + np.arange(self.n_frames)[None, :]
        X_i = jnp.transpose(X_i[widx], (0, 2, 1))         # (n_win, n_mels, n_frames)
        if x_j is None:
            return X_i, X_i
        X_j = logmelspec_pallas(x_j.reshape(1, -1), self.cfg, self.params)[0].T
        X_j = jnp.transpose(X_j[widx], (0, 2, 1))
        return X_i, X_j


if __name__ == "__main__":
    cfg = {
        "fs": 8000,
        "overlap": 0.5,
        "arch": "resnet",
        "n_frames": 8,
        "win_len": 256,
        "hop_len": 128,
        "n_fft": 256,
        "n_mels": 64,
    }

    key = jax.random.PRNGKey(0)
    k1, k2 = jax.random.split(key)
    B, time = 2, 2048
    x_i = jax.random.normal(k1, (B, time), dtype=jnp.float32)
    x_j = jax.random.normal(k2, (B, time), dtype=jnp.float32)

    transform = GPUTransformSamplesPallas(cfg, train=True)
    X_i, X_j = transform(x_i, x_j)
    jax.block_until_ready((X_i, X_j))

    T = 1 + time // cfg["hop_len"]
    assert X_i.shape == (B, cfg["n_mels"], T), X_i.shape
    assert X_j.shape == (B, cfg["n_mels"], T), X_j.shape
    assert bool(jnp.all(jnp.isfinite(X_i))) and bool(jnp.all(jnp.isfinite(X_j)))
    print("KERNEL_OK")
</pallas_src>

<mosaic_0001>
module attributes {stable_mosaic.version = 11 : i64} {
  func.func @logmel_kernel(%arg0: i32, %arg1: memref<40x256xf32, #tpu.memory_space<vmem>>, %arg2: memref<256x256xf32, #tpu.memory_space<vmem>>, %arg3: memref<256x128xf32, #tpu.memory_space<vmem>>, %arg4: memref<40x128xf32, #tpu.memory_space<vmem>>) attributes {dimension_semantics = [#tpu.dimension_semantics<parallel>], iteration_bounds = array<i64: 1>, scalar_prefetch = 0 : i64, scratch_operands = 0 : i64, tpu.core_type = #tpu.core_type<tc>, window_params = [{transform_indices = @transform_0, window_bounds = array<i64: 40, 256>}, {pipeline_mode = #tpu.pipeline_mode<synchronous>, transform_indices = @transform_1, window_bounds = array<i64: 256, 256>}, {pipeline_mode = #tpu.pipeline_mode<synchronous>, transform_indices = @transform_2, window_bounds = array<i64: 256, 128>}, {transform_indices = @transform_3, window_bounds = array<i64: 40, 128>}]} {
    %c0 = arith.constant 0 : index
    %c0_0 = arith.constant 0 : index
    %0 = vector.load %arg1[%c0, %c0_0] : memref<40x256xf32, #tpu.memory_space<vmem>>, vector<40x256xf32>
    %c0_1 = arith.constant 0 : index
    %c0_2 = arith.constant 0 : index
    %1 = vector.load %arg2[%c0_1, %c0_2] : memref<256x256xf32, #tpu.memory_space<vmem>>, vector<256x256xf32>
    %cst = arith.constant dense<0.000000e+00> : vector<40x256xf32>
    %2 = tpu.matmul %0, %1, %cst {dimension_numbers = #tpu.dot_dimension_numbers<[1], [0], [0], [1], [0, 0, 1, 1], [], []>} : vector<40x256xf32>, vector<256x256xf32>, vector<40x256xf32> -> vector<40x256xf32>
    %3 = arith.mulf %2, %2 : vector<40x256xf32>
    %c0_3 = arith.constant 0 : index
    %c0_4 = arith.constant 0 : index
    %4 = vector.load %arg3[%c0_3, %c0_4] : memref<256x128xf32, #tpu.memory_space<vmem>>, vector<256x128xf32>
    %cst_5 = arith.constant dense<0.000000e+00> : vector<40x128xf32>
    %5 = tpu.matmul %3, %4, %cst_5 {dimension_numbers = #tpu.dot_dimension_numbers<[1], [0], [0], [1], [0, 0, 1, 1], [], []>} : vector<40x256xf32>, vector<256x128xf32>, vector<40x128xf32> -> vector<40x128xf32>
    %cst_6 = arith.constant 1.000000e-10 : f32
    %6 = vector.broadcast %cst_6 : f32 to vector<40x128xf32>
    %7 = arith.maximumf %5, %6 : vector<40x128xf32>
    %8 = math.log %7 : vector<40x128xf32>
    %cst_7 = arith.constant 0.434294492 : f32
    %9 = vector.broadcast %cst_7 : f32 to vector<40x128xf32>
    %10 = arith.mulf %8, %9 : vector<40x128xf32>
    %cst_8 = arith.constant 1.000000e+01 : f32
    %11 = vector.broadcast %cst_8 : f32 to vector<40x128xf32>
    %12 = arith.mulf %11, %10 : vector<40x128xf32>
    %c0_9 = arith.constant 0 : index
    %c0_10 = arith.constant 0 : index
    %13 = vector.load %arg4[%c0_9, %c0_10] : memref<40x128xf32, #tpu.memory_space<vmem>>, vector<40x128xf32>
    tpu.vector_store %arg4[%c0_9, %c0_10], %12 {strides = array<i32>} : memref<40x128xf32, #tpu.memory_space<vmem>>, vector<40x128xf32>,
    return
  }
  func.func @transform_0(%arg0: i32) -> (i32, i32) {
    %c0_i32 = arith.constant 0 : i32
    %c0_i32_0 = arith.constant 0 : i32
    return %arg0, %c0_i32 : i32, i32
  }
  func.func @transform_1(%arg0: i32) -> (i32, i32) {
    %c0_i32 = arith.constant 0 : i32
    %c0_i32_0 = arith.constant 0 : i32
    %c0_i32_1 = arith.constant 0 : i32
    return %c0_i32, %c0_i32_0 : i32, i32
  }
  func.func @transform_2(%arg0: i32) -> (i32, i32) {
    %c0_i32 = arith.constant 0 : i32
    %c0_i32_0 = arith.constant 0 : i32
    %c0_i32_1 = arith.constant 0 : i32
    return %c0_i32, %c0_i32_0 : i32, i32
  }
  func.func @transform_3(%arg0: i32) -> (i32, i32) {
    %c0_i32 = arith.constant 0 : i32
    %c0_i32_0 = arith.constant 0 : i32
    return %arg0, %c0_i32 : i32, i32
  }
}

</mosaic_0001>

<bundles_post_ra>
// kernel: tpu_custom_call.1
= control target key start
LH: loop header
LB: loop body
LE: loop exit
PB: predicated region body
PF: predicated region fallthrough
CT: control target
= control target key end

     0   :  { %8 = vsyncpa [#allocation3], 0  ;;  %s618_s0 = inlined_call_operand.hbm [shape: f32[40,256], index: 0, kind: input, shape index: {}]   ;;  %s619_s1 = inlined_call_operand.hbm [shape: f32[256,256], index: 1, kind: input, shape index: {}]   ;;  %s620_s2 = inlined_call_operand.hbm [shape: f32[256,128], index: 2, kind: input, shape index: {}]   ;;  %s621_s3 = inlined_call_operand.hbm [shape: f32[40,128], index: 3, kind: output, shape index: {}]  }
   0x1   :  { %9 = vsyncpa [#allocation6], 0 }
   0x2   :  { %10 = vsyncpa [#allocation4], 0  ;;  %s28_s14 = sshll.u32 %s619_s1, 4  ;;  %s572_s15 = smov [#allocation5]   ;;  %s29_s14 = int_to_ptr.hbm [resolvable:$true] %s28_s14 }
   0x3   :  { %s30_s16 = sshll.u32 %s572_s15, 4  ;;  %s15_s19 = sshll.u32 %s618_s0, 4  ;;  %s31_s16 = int_to_ptr.vmem [resolvable:$true] %s30_s16  ;;  %s16_s19 = int_to_ptr.hbm [resolvable:$true] %s15_s19 }
   0x4   :  { %s573_s20 = smov 256   ;;  %s574_s21 = smov 16  }
   0x5   :  { %36 = dma.hbm_to_vmem [thread:$0]  %s29_s14, 8192, %s31_s16, [#allocation6], %s573_s20, %s573_s20, %s574_s21  }
   0x6   :  { %s575_s22 = smov [#allocation2]   ;;  %s41_s26 = sshll.u32 %s620_s2, 4  ;;  %s42_s26 = int_to_ptr.hbm [resolvable:$true] %s41_s26 }
   0x7   :  { %s17_s23 = sshll.u32 %s575_s22, 4  ;;  %s576_s1 = smov [#allocation7]   ;;  %s18_s23 = int_to_ptr.vmem [resolvable:$true] %s17_s23 }
   0x8   :  { %23 = dma.hbm_to_vmem [thread:$0]  %s16_s19, 1280, %s18_s23, [#allocation3], %s573_s20, %s573_s20, %s574_s21  }
   0x9   :  { %s43_s27 = sshll.u32 %s576_s1, 4  ;;  %s577_s28 = smov 128   ;;  %s44_s27 = int_to_ptr.vmem [resolvable:$true] %s43_s27 }
   0xa   :  { %s578_s29 = smov 8  }
   0xb   :  { %49 = dma.hbm_to_vmem [thread:$0]  %s42_s26, 4096, %s44_s27, [#allocation6], %s577_s28, %s577_s28, %s578_s29  }
   0xc   :  { %566 = dma.done.wait [#allocation3], 1280  }
   0xd   :  { %567 = vsyncadd [#allocation3], 4294966016 }
   0xe   :  { %568 = dma.done.wait [#allocation6], 12288  }
   0xf   :  { %569 = vsyncadd [#allocation6], 4294955008  ;;  %v103_v0 = vld [vmem:[#allocation5 + $0xf8] sm:$0xff]  ;;  %v101_v2 = vld [vmem:[#allocation5 + $0xe8] sm:$0xff]  ;;  %s579_s0 = smov [#allocation8]   ;;  %s406_s5 = sshll.u32 %s621_s3, 4  ;;  %s407_s5 = int_to_ptr.hbm [resolvable:$true] %s406_s5 }
  0x10   :  { %v135_v1 = vld [vmem:[#allocation5 + $0x1f8] sm:$0xff]  ;;  %200 = vmatpush.msra.mxu2 %v103_v0  ;;  %v133_v3 = vld [vmem:[#allocation5 + $0x1e8] sm:$0xff]  ;;  %v102_v6 = vld [vmem:[#allocation5 + $0xf0] sm:$0xff]  ;;  %s404_s2 = sshll.u32 %s579_s0, 4  ;;  %s405_s2 = int_to_ptr.vmem [resolvable:$true] %s404_s2 }
  0x11   :  { %232 = vmatpush.msra.mxu3 %v135_v1  ;;  %v99_v4 = vld [vmem:[#allocation5 + $0xd8] sm:$0xff]  ;;  %v134_v7 = vld [vmem:[#allocation5 + $0x1f0] sm:$0xff]  ;;  %v100_v8 = vld [vmem:[#allocation5 + $0xe0] sm:$0xff]  ;;  %136 = vmatpush.msra.mxu0 %v102_v6 }
  0x12   :  { %v131_v5 = vld [vmem:[#allocation5 + $0x1d8] sm:$0xff]  ;;  %201 = vmatpush.msra.mxu2 %v101_v2  ;;  %v132_v9 = vld [vmem:[#allocation5 + $0x1e0] sm:$0xff]  ;;  %168 = vmatpush.msra.mxu1 %v134_v7  ;;  %v97_v10 = vld [vmem:[#allocation5 + $0xc8] sm:$0xff] }
  0x13   :  { %233 = vmatpush.msra.mxu3 %v133_v3  ;;  %v129_v11 = vld [vmem:[#allocation5 + $0x1c8] sm:$0xff]  ;;  %v98_v12 = vld [vmem:[#allocation5 + $0xd0] sm:$0xff]  ;;  %137 = vmatpush.msra.mxu0 %v100_v8  ;;  %v95_v14 = vld [vmem:[#allocation5 + $0xb8] sm:$0xff] }
  0x14   :  { %202 = vmatpush.msra.mxu2 %v99_v4  ;;  %v130_v13 = vld [vmem:[#allocation5 + $0x1d0] sm:$0xff]  ;;  %169 = vmatpush.msra.mxu1 %v132_v9  ;;  %v127_v15 = vld [vmem:[#allocation5 + $0x1b8] sm:$0xff]  ;;  %v96_v16 = vld [vmem:[#allocation5 + $0xc0] sm:$0xff] }
  0x15   :  { %234 = vmatpush.msra.mxu3 %v131_v5  ;;  %v128_v17 = vld [vmem:[#allocation5 + $0x1c0] sm:$0xff]  ;;  %138 = vmatpush.msra.mxu0 %v98_v12  ;;  %v93_v18 = vld [vmem:[#allocation5 + $0xa8] sm:$0xff]  ;;  %v94_v20 = vld [vmem:[#allocation5 + $0xb0] sm:$0xff] }
  0x16   :  { %203 = vmatpush.msra.mxu2 %v97_v10  ;;  %170 = vmatpush.msra.mxu1 %v130_v13  ;;  %v125_v19 = vld [vmem:[#allocation5 + $0x1a8] sm:$0xff]  ;;  %v126_v21 = vld [vmem:[#allocation5 + $0x1b0] sm:$0xff]  ;;  %v91_v22 = vld [vmem:[#allocation5 + $0x98] sm:$0xff] }
  0x17   :  { %235 = vmatpush.msra.mxu3 %v129_v11  ;;  %139 = vmatpush.msra.mxu0 %v96_v16  ;;  %v123_v23 = vld [vmem:[#allocation5 + $0x198] sm:$0xff]  ;;  %v92_v24 = vld [vmem:[#allocation5 + $0xa0] sm:$0xff]  ;;  %v89_v26 = vld [vmem:[#allocation5 + $0x88] sm:$0xff] }
  0x18   :  { %204 = vmatpush.msra.mxu2 %v95_v14  ;;  %171 = vmatpush.msra.mxu1 %v128_v17  ;;  %v124_v25 = vld [vmem:[#allocation5 + $0x1a0] sm:$0xff]  ;;  %v121_v27 = vld [vmem:[#allocation5 + $0x188] sm:$0xff]  ;;  %v90_v28 = vld [vmem:[#allocation5 + $0x90] sm:$0xff] }
  0x19   :  { %236 = vmatpush.msra.mxu3 %v127_v15  ;;  %140 = vmatpush.msra.mxu0 %v94_v20  ;;  %v122_v29 = vld [vmem:[#allocation5 + $0x190] sm:$0xff]  ;;  %v87_v30 = vld [vmem:[#allocation5 + $0x78] sm:$0xff]  ;;  %v88_v32 = vld [vmem:[#allocation5 + $0x80] sm:$0xff] }
  0x1a   :  { %205 = vmatpush.msra.mxu2 %v93_v18  ;;  %172 = vmatpush.msra.mxu1 %v126_v21  ;;  %v119_v31 = vld [vmem:[#allocation5 + $0x178] sm:$0xff]  ;;  %v120_v33 = vld [vmem:[#allocation5 + $0x180] sm:$0xff]  ;;  %v85_v34 = vld [vmem:[#allocation5 + $0x68] sm:$0xff] }
  0x1b   :  { %237 = vmatpush.msra.mxu3 %v125_v19  ;;  %141 = vmatpush.msra.mxu0 %v92_v24  ;;  %v117_v35 = vld [vmem:[#allocation5 + $0x168] sm:$0xff]  ;;  %v86_v36 = vld [vmem:[#allocation5 + $0x70] sm:$0xff]  ;;  %v83_v38 = vld [vmem:[#allocation5 + $0x58] sm:$0xff] }
  0x1c   :  { %206 = vmatpush.msra.mxu2 %v91_v22  ;;  %173 = vmatpush.msra.mxu1 %v124_v25  ;;  %v118_v37 = vld [vmem:[#allocation5 + $0x170] sm:$0xff]  ;;  %v115_v39 = vld [vmem:[#allocation5 + $0x158] sm:$0xff]  ;;  %v84_v40 = vld [vmem:[#allocation5 + $0x60] sm:$0xff] }
  0x1d   :  { %238 = vmatpush.msra.mxu3 %v123_v23  ;;  %142 = vmatpush.msra.mxu0 %v90_v28  ;;  %v116_v41 = vld [vmem:[#allocation5 + $0x160] sm:$0xff]  ;;  %v81_v42 = vld [vmem:[#allocation5 + $0x48] sm:$0xff]  ;;  %v82_v44 = vld [vmem:[#allocation5 + $0x50] sm:$0xff] }
  0x1e   :  { %207 = vmatpush.msra.mxu2 %v89_v26  ;;  %174 = vmatpush.msra.mxu1 %v122_v29  ;;  %v113_v43 = vld [vmem:[#allocation5 + $0x148] sm:$0xff]  ;;  %v114_v45 = vld [vmem:[#allocation5 + $0x150] sm:$0xff]  ;;  %v79_v46 = vld [vmem:[#allocation5 + $0x38] sm:$0xff] }
  0x1f   :  { %239 = vmatpush.msra.mxu3 %v121_v27  ;;  %143 = vmatpush.msra.mxu0 %v88_v32  ;;  %v111_v47 = vld [vmem:[#allocation5 + $0x138] sm:$0xff]  ;;  %v80_v48 = vld [vmem:[#allocation5 + $0x40] sm:$0xff]  ;;  %v77_v50 = vld [vmem:[#allocation5 + $0x28] sm:$0xff] }
  0x20   :  { %208 = vmatpush.msra.mxu2 %v87_v30  ;;  %175 = vmatpush.msra.mxu1 %v120_v33  ;;  %v112_v49 = vld [vmem:[#allocation5 + $0x140] sm:$0xff]  ;;  %v109_v51 = vld [vmem:[#allocation5 + $0x128] sm:$0xff]  ;;  %v78_v52 = vld [vmem:[#allocation5 + $0x30] sm:$0xff] }
  0x21   :  { %240 = vmatpush.msra.mxu3 %v119_v31  ;;  %144 = vmatpush.msra.mxu0 %v86_v36  ;;  %v110_v53 = vld [vmem:[#allocation5 + $0x130] sm:$0xff]  ;;  %v75_v54 = vld [vmem:[#allocation5 + $0x18] sm:$0xff]  ;;  %v76_v56 = vld [vmem:[#allocation5 + $0x20] sm:$0xff] }
  0x22   :  { %209 = vmatpush.msra.mxu2 %v85_v34  ;;  %176 = vmatpush.msra.mxu1 %v118_v37  ;;  %v107_v55 = vld [vmem:[#allocation5 + $0x118] sm:$0xff]  ;;  %v108_v57 = vld [vmem:[#allocation5 + $0x120] sm:$0xff]  ;;  %v73_v58 = vld [vmem:[#allocation5 + $0x8] sm:$0xff] }
  0x23   :  { %241 = vmatpush.msra.mxu3 %v117_v35  ;;  %145 = vmatpush.msra.mxu0 %v84_v40  ;;  %v105_v59 = vld [vmem:[#allocation5 + $0x108] sm:$0xff]  ;;  %v62_v60 = vld [vmem:[#allocation2] sm:$0xff]  ;;  %v63_v61 = vld [vmem:[#allocation2 + $0x8] sm:$0xff] }
  0x24   :  { %210 = vmatpush.msra.mxu2 %v83_v38  ;;  %177 = vmatpush.msra.mxu1 %v116_v41  ;;  %v74_v62 = vld [vmem:[#allocation5 + $0x10] sm:$0xff]  ;;  %v72_v0 = vld [vmem:[#allocation5] sm:$0xff]  ;;  %v289_v2 = vld [vmem:[#allocation7 + $0x78] sm:$0xff] }
  0x25   :  { %242 = vmatpush.msra.mxu3 %v115_v39  ;;  %146 = vmatpush.msra.mxu0 %v82_v44  ;;  %v106_v63 = vld [vmem:[#allocation5 + $0x110] sm:$0xff]  ;;  %v104_v1 = vld [vmem:[#allocation5 + $0x100] sm:$0xff]  ;;  %v305_v3 = vld [vmem:[#allocation7 + $0xf8] sm:$0xff] }
  0x26   :  { %211 = vmatpush.msra.mxu2 %v81_v42  ;;  %178 = vmatpush.msra.mxu1 %v114_v45  ;;  %v288_v4 = vld [vmem:[#allocation7 + $0x70] sm:$0xff]  ;;  %v64_v5 = vld [vmem:[#allocation2 + $0x10] sm:$0xff]  ;;  %v65_v6 = vld [vmem:[#allocation2 + $0x18] sm:$0xff] }
  0x27   :  { %243 = vmatpush.msra.mxu3 %v113_v43  ;;  %147 = vmatpush.msra.mxu0 %v80_v48  ;;  %v304_v7 = vld [vmem:[#allocation7 + $0xf0] sm:$0xff]  ;;  %v287_v8 = vld [vmem:[#allocation7 + $0x68] sm:$0xff]  ;;  %v286_v10 = vld [vmem:[#allocation7 + $0x60] sm:$0xff] }
  0x28   :  { %212 = vmatpush.msra.mxu2 %v79_v46  ;;  %179 = vmatpush.msra.mxu1 %v112_v49  ;;  %v303_v9 = vld [vmem:[#allocation7 + $0xe8] sm:$0xff]  ;;  %v302_v11 = vld [vmem:[#allocation7 + $0xe0] sm:$0xff]  ;;  %v285_v12 = vld [vmem:[#allocation7 + $0x58] sm:$0xff] }
  0x29   :  { %244 = vmatpush.msra.mxu3 %v111_v47  ;;  %148 = vmatpush.msra.mxu0 %v78_v52  ;;  %v301_v13 = vld [vmem:[#allocation7 + $0xd8] sm:$0xff]  ;;  %v284_v14 = vld [vmem:[#allocation7 + $0x50] sm:$0xff]  ;;  %v283_v18 = vld [vmem:[#allocation7 + $0x48] sm:$0xff] }
  0x2a   :  { %213 = vmatpush.msra.mxu2 %v77_v50  ;;  %180 = vmatpush.msra.mxu1 %v110_v53  ;;  %v300_v15 = vld [vmem:[#allocation7 + $0xd0] sm:$0xff]  ;;  %v67_v17 = vld [vmem:[#allocation2 + $0x28] sm:$0xff]  ;;  %v299_v19 = vld [vmem:[#allocation7 + $0xc8] sm:$0xff] }
  0x2b   :  { %245 = vmatpush.msra.mxu3 %v109_v51  ;;  %149 = vmatpush.msra.mxu0 %v76_v56  ;;  %v66_v16 = vld [vmem:[#allocation2 + $0x20] sm:$0xff]  ;;  %v282_v20 = vld [vmem:[#allocation7 + $0x40] sm:$0xff]  ;;  %v281_v22 = vld [vmem:[#allocation7 + $0x38] sm:$0xff] }
  0x2c   :  { %214 = vmatpush.msra.mxu2 %v75_v54  ;;  %181 = vmatpush.msra.mxu1 %v108_v57  ;;  %v298_v21 = vld [vmem:[#allocation7 + $0xc0] sm:$0xff]  ;;  %v297_v23 = vld [vmem:[#allocation7 + $0xb8] sm:$0xff]  ;;  %v280_v24 = vld [vmem:[#allocation7 + $0x30] sm:$0xff] }
  0x2d   :  { %246 = vmatpush.msra.mxu3 %v107_v55  ;;  %150 = vmatpush.msra.mxu0 %v74_v62  ;;  %v296_v25 = vld [vmem:[#allocation7 + $0xb0] sm:$0xff]  ;;  %v68_v26 = vld [vmem:[#allocation2 + $0x30] sm:$0xff]  ;;  %v69_v27 = vld [vmem:[#allocation2 + $0x38] sm:$0xff] }
  0x2e   :  { %215 = vmatpush.msra.mxu2 %v73_v58  ;;  %182 = vmatpush.msra.mxu1 %v106_v63  ;;  %v279_v28 = vld [vmem:[#allocation7 + $0x28] sm:$0xff]  ;;  %v278_v30 = vld [vmem:[#allocation7 + $0x20] sm:$0xff]  ;;  %v277_v32 = vld [vmem:[#allocation7 + $0x18] sm:$0xff] }
  0x2f   :  { %247 = vmatpush.msra.mxu3 %v105_v59  ;;  %216 = vmatmul.f32.vlgmr.msra.gmra.mxu2 %v62_v60  ;;  %v295_v29 = vld [vmem:[#allocation7 + $0xa8] sm:$0xff]  ;;  %v294_v31 = vld [vmem:[#allocation7 + $0xa0] sm:$0xff]  ;;  %v293_v33 = vld [vmem:[#allocation7 + $0x98] sm:$0xff] }
  0x30   :  { %248 = vmatmul.f32.vlgmr.msra.gmra.mxu3 %v63_v61  ;;  %151 = vmatpush.msra.mxu0 %v72_v0  ;;  %v70_v34 = vld [vmem:[#allocation2 + $0x40] sm:$0xff]  ;;  %v71_v35 = vld [vmem:[#allocation2 + $0x48] sm:$0xff]  ;;  %v275_v38 = vld [vmem:[#allocation7 + $0x8] sm:$0xff] }
  0x31   :  { %183 = vmatpush.msra.mxu1 %v104_v1  ;;  %152 = vmatmul.f32.vlgmr.msra.gmra.mxu0 %v62_v60  ;;  %v276_v36 = vld [vmem:[#allocation7 + $0x10] sm:$0xff]  ;;  %v291_v39 = vld [vmem:[#allocation7 + $0x88] sm:$0xff]  ;;  %v274_v40 = vld [vmem:[#allocation7] sm:$0xff] }
  0x32   :  { %184 = vmatmul.f32.vlgmr.msra.gmra.mxu1 %v63_v61  ;;  %306 = vmatpush.msrb.mxu0 %v289_v2  ;;  %v292_v37 = vld [vmem:[#allocation7 + $0x90] sm:$0xff]  ;;  %v290_v41 = vld [vmem:[#allocation7 + $0x80] sm:$0xff] }
  0x33   :  { %338 = vmatpush.msrb.mxu1 %v305_v3  ;;  %420 = vmatpush.msrb.mxu2 %v289_v2 }
  0x34   :  { %436 = vmatpush.msrb.mxu3 %v305_v3  ;;  %307 = vmatpush.msrb.mxu0 %v288_v4 }
  0x35   :  { %339 = vmatpush.msrb.mxu1 %v304_v7  ;;  %421 = vmatpush.msrb.mxu2 %v288_v4 }
  0x36   :  { %308 = vmatpush.msrb.mxu0 %v287_v8  ;;  %437 = vmatpush.msrb.mxu3 %v304_v7 }
  0x37   :  { %219 = vmatmul.f32.gmra.mxu2 %v64_v5  ;;  %340 = vmatpush.msrb.mxu1 %v303_v9 }
  0x38   :  { %251 = vmatmul.f32.gmra.mxu3 %v65_v6  ;;  %309 = vmatpush.msrb.mxu0 %v286_v10 }
  0x39   :  { %341 = vmatpush.msrb.mxu1 %v302_v11  ;;  %155 = vmatmul.f32.gmra.mxu0 %v64_v5 }
  0x3a   :  { %187 = vmatmul.f32.gmra.mxu1 %v65_v6  ;;  %310 = vmatpush.msrb.mxu0 %v285_v12 }
  0x3b   :  { %342 = vmatpush.msrb.mxu1 %v301_v13  ;;  %422 = vmatpush.msrb.mxu2 %v287_v8 }
  0x3c   :  { %438 = vmatpush.msrb.mxu3 %v303_v9  ;;  %311 = vmatpush.msrb.mxu0 %v284_v14 }
  0x3d   :  { %343 = vmatpush.msrb.mxu1 %v300_v15  ;;  %423 = vmatpush.msrb.mxu2 %v286_v10 }
  0x3e   :  { %312 = vmatpush.msrb.mxu0 %v283_v18  ;;  %439 = vmatpush.msrb.mxu3 %v302_v11 }
  0x3f   :  { %222 = vmatmul.f32.gmra.mxu2 %v66_v16  ;;  %344 = vmatpush.msrb.mxu1 %v299_v19 }
  0x40   :  { %254 = vmatmul.f32.gmra.mxu3 %v67_v17  ;;  %313 = vmatpush.msrb.mxu0 %v282_v20 }
  0x41   :  { %345 = vmatpush.msrb.mxu1 %v298_v21  ;;  %158 = vmatmul.f32.gmra.mxu0 %v66_v16 }
  0x42   :  { %190 = vmatmul.f32.gmra.mxu1 %v67_v17  ;;  %314 = vmatpush.msrb.mxu0 %v281_v22 }
  0x43   :  { %346 = vmatpush.msrb.mxu1 %v297_v23  ;;  %424 = vmatpush.msrb.mxu2 %v285_v12 }
  0x44   :  { %440 = vmatpush.msrb.mxu3 %v301_v13  ;;  %315 = vmatpush.msrb.mxu0 %v280_v24 }
  0x45   :  { %347 = vmatpush.msrb.mxu1 %v296_v25  ;;  %425 = vmatpush.msrb.mxu2 %v284_v14 }
  0x46   :  { %316 = vmatpush.msrb.mxu0 %v279_v28  ;;  %441 = vmatpush.msrb.mxu3 %v300_v15 }
  0x47   :  { %225 = vmatmul.f32.gmra.mxu2 %v68_v26  ;;  %348 = vmatpush.msrb.mxu1 %v295_v29 }
  0x48   :  { %257 = vmatmul.f32.gmra.mxu3 %v69_v27  ;;  %317 = vmatpush.msrb.mxu0 %v278_v30 }
  0x49   :  { %349 = vmatpush.msrb.mxu1 %v294_v31  ;;  %161 = vmatmul.f32.gmra.mxu0 %v68_v26 }
  0x4a   :  { %193 = vmatmul.f32.gmra.mxu1 %v69_v27  ;;  %318 = vmatpush.msrb.mxu0 %v277_v32 }
  0x4b   :  { %350 = vmatpush.msrb.mxu1 %v293_v33  ;;  %426 = vmatpush.msrb.mxu2 %v283_v18 }
  0x4c   :  { %442 = vmatpush.msrb.mxu3 %v299_v19  ;;  %319 = vmatpush.msrb.mxu0 %v276_v36 }
  0x4d   :  { %427 = vmatpush.msrb.mxu2 %v282_v20  ;;  %351 = vmatpush.msrb.mxu1 %v292_v37 }
  0x4e   :  { %443 = vmatpush.msrb.mxu3 %v298_v21  ;;  %320 = vmatpush.msrb.mxu0 %v275_v38 }
  0x4f   :  { %228 = vmatmul.f32.gmra.mxu2 %v70_v34  ;;  %352 = vmatpush.msrb.mxu1 %v291_v39 }
  0x50   :  { %260 = vmatmul.f32.gmra.mxu3 %v71_v35  ;;  %428 = vmatpush.msrb.mxu2 %v281_v22 }
  0x51   :  { %444 = vmatpush.msrb.mxu3 %v297_v23  ;;  %164 = vmatmul.f32.gmra.mxu0 %v70_v34 }
  0x52   :  { %196 = vmatmul.f32.gmra.mxu1 %v71_v35  ;;  %429 = vmatpush.msrb.mxu2 %v280_v24 }
  0x53   :  { %445 = vmatpush.msrb.mxu3 %v296_v25  ;;  %321 = vmatpush.msrb.mxu0 %v274_v40 }
  0x54   :  { %430 = vmatpush.msrb.mxu2 %v279_v28  ;;  %353 = vmatpush.msrb.mxu1 %v290_v41 }
  0x55   :  { %446 = vmatpush.msrb.mxu3 %v295_v29 }
  0x56   :  { %431 = vmatpush.msrb.mxu2 %v278_v30 }
  0x57   :  { %447 = vmatpush.msrb.mxu3 %v294_v31 }
  0x58   :  { %432 = vmatpush.msrb.mxu2 %v277_v32 }
  0x59   :  { %448 = vmatpush.msrb.mxu3 %v293_v33 }
  0x5a   :  { %433 = vmatpush.msrb.mxu2 %v276_v36 }
  0x5b   :  { %449 = vmatpush.msrb.mxu3 %v292_v37 }
  0x5c   :  { %434 = vmatpush.msrb.mxu2 %v275_v38 }
  0x5d   :  { %450 = vmatpush.msrb.mxu3 %v291_v39 }
  0x5e   :  { %435 = vmatpush.msrb.mxu2 %v274_v40 }
  0x5f   :  { %451 = vmatpush.msrb.mxu3 %v290_v41 }
  0xae   :  { %v153_v42 = vpop.f32.mrf.mxu0 }
  0xaf   :  { %v185_v43 = vpop.f32.mrf.mxu1 }
  0xb0   :  { %v186_v44 = vadd.f32 %v185_v43, %v153_v42 }
  0xb2   :  { %v217_v45 = vpop.f32.mrf.mxu2  ;;  %v264_v47 = vmul.f32 %v186_v44, %v186_v44 }
  0xb3   :  { %v249_v46 = vpop.f32.mrf.mxu3 }
  0xb4   :  { %v250_v48 = vadd.f32 %v249_v46, %v217_v45  ;;  %322 = vmatmul.f32.vlgmr.msrb.gmra.mxu0 %v264_v47 }
  0xb6   :  { %v265_v49 = vmul.f32 %v250_v48, %v250_v48  ;;  %v156_v50 = vpop.f32.mrf.mxu0 }
  0xb7   :  { %v188_v51 = vpop.f32.mrf.mxu1 }
  0xb8   :  { %354 = vmatmul.f32.vlgmr.msrb.gmra.mxu1 %v265_v49  ;;  %v189_v52 = vadd.f32 %v188_v51, %v156_v50 }
  0xba   :  { %v220_v53 = vpop.f32.mrf.mxu2  ;;  %v266_v55 = vmul.f32 %v189_v52, %v189_v52 }
  0xbb   :  { %v252_v54 = vpop.f32.mrf.mxu3 }
  0xbc   :  { %v253_v56 = vadd.f32 %v252_v54, %v220_v53  ;;  %325 = vmatmul.f32.gmra.mxu0 %v266_v55 }
  0xbe   :  { %v267_v57 = vmul.f32 %v253_v56, %v253_v56  ;;  %v159_v58 = vpop.f32.mrf.mxu0 }
  0xbf   :  { %v191_v59 = vpop.f32.mrf.mxu1 }
  0xc0   :  { %357 = vmatmul.f32.gmra.mxu1 %v267_v57  ;;  %v192_v60 = vadd.f32 %v191_v59, %v159_v58 }
  0xc2   :  { %v223_v61 = vpop.f32.mrf.mxu2  ;;  %v268_v63 = vmul.f32 %v192_v60, %v192_v60 }
  0xc3   :  { %v255_v62 = vpop.f32.mrf.mxu3 }
  0xc4   :  { %v256_v0 = vadd.f32 %v255_v62, %v223_v61  ;;  %328 = vmatmul.f32.gmra.mxu0 %v268_v63 }
  0xc6   :  { %v269_v1 = vmul.f32 %v256_v0, %v256_v0  ;;  %v162_v2 = vpop.f32.mrf.mxu0 }
  0xc7   :  { %v194_v3 = vpop.f32.mrf.mxu1 }
  0xc8   :  { %360 = vmatmul.f32.gmra.mxu1 %v269_v1  ;;  %v195_v4 = vadd.f32 %v194_v3, %v162_v2 }
  0xca   :  { %v226_v5 = vpop.f32.mrf.mxu2  ;;  %v270_v7 = vmul.f32 %v195_v4, %v195_v4 }
  0xcb   :  { %v258_v6 = vpop.f32.mrf.mxu3 }
  0xcc   :  { %v259_v8 = vadd.f32 %v258_v6, %v226_v5  ;;  %331 = vmatmul.f32.vlgmr.msrb.gmra.mxu2 %v270_v7 }
  0xce   :  { %v271_v9 = vmul.f32 %v259_v8, %v259_v8  ;;  %v165_v10 = vpop.f32.mrf.mxu0 }
  0xcf   :  { %v197_v11 = vpop.f32.mrf.mxu1 }
  0xd0   :  { %363 = vmatmul.f32.vlgmr.msrb.gmra.mxu3 %v271_v9  ;;  %v198_v12 = vadd.f32 %v197_v11, %v165_v10 }
  0xd2   :  { %v229_v13 = vpop.f32.mrf.mxu2  ;;  %v272_v15 = vmul.f32 %v198_v12, %v198_v12 }
  0xd3   :  { %v261_v14 = vpop.f32.mrf.mxu3 }
  0xd4   :  { %v262_v16 = vadd.f32 %v261_v14, %v229_v13  ;;  %334 = vmatmul.f32.gmra.mxu2 %v272_v15 }
  0xd6   :  { %v273_v17 = vmul.f32 %v262_v16, %v262_v16 }
  0xd8   :  { %366 = vmatmul.f32.gmra.mxu3 %v273_v17 }
 0x131   :  { %v323_v18 = vpop.f32.mrf.mxu0 }
 0x135   :  { %v355_v19 = vpop.f32.mrf.mxu1 }
 0x136   :  { %v356_v20 = vadd.f32 %v355_v19, %v323_v18 }
 0x138   :  { %v370_v21 = vmax.f32 %v356_v20, 1e-10 }
 0x139   :  { %v326_v22 = vpop.f32.mrf.mxu0 }
 0x13a   :  { %460 = vlog2.f32 %v370_v21 }
 0x13d   :  { %v358_v23 = vpop.f32.mrf.mxu1 }
 0x13e   :  { %v359_v24 = vadd.f32 %v358_v23, %v326_v22 }
 0x140   :  { %v461_v25 = vpop.eup %460  ;;  %v371_v26 = vmax.f32 %v359_v24, 1e-10 }
 0x141   :  { %v376_v27 = vmul.f32 0.6931472, %v461_v25  ;;  %v329_v29 = vpop.f32.mrf.mxu0 }
 0x142   :  { %462 = vlog2.f32 %v371_v26 }
 0x143   :  { %v385_v28 = vmul.f32 0.4342945, %v376_v27 }
 0x145   :  { %v390_v30 = vmul.f32 10.0, %v385_v28  ;;  %v361_v31 = vpop.f32.mrf.mxu1 }
 0x146   :  { %v362_v32 = vadd.f32 %v361_v31, %v329_v29 }
 0x147   :  { %395 = vst [vmem:[#allocation8] sm:$0xff] %v390_v30 }
 0x148   :  { %v463_v33 = vpop.eup %462  ;;  %v372_v34 = vmax.f32 %v362_v32, 1e-10 }
 0x149   :  { %v378_v35 = vmul.f32 0.6931472, %v463_v33 }
 0x14a   :  { %464 = vlog2.f32 %v372_v34 }
 0x14b   :  { %v386_v36 = vmul.f32 0.4342945, %v378_v35 }
 0x14d   :  { %v391_v37 = vmul.f32 10.0, %v386_v36 }
 0x14f   :  { %396 = vst [vmem:[#allocation8 + $0x8] sm:$0xff] %v391_v37  ;;  %v332_v40 = vpop.f32.mrf.mxu2 }
 0x150   :  { %v465_v38 = vpop.eup %464 }
 0x151   :  { %v380_v39 = vmul.f32 0.6931472, %v465_v38 }
 0x153   :  { %v387_v41 = vmul.f32 0.4342945, %v380_v39  ;;  %v364_v42 = vpop.f32.mrf.mxu3 }
 0x154   :  { %v365_v43 = vadd.f32 %v364_v42, %v332_v40 }
 0x155   :  { %v392_v44 = vmul.f32 10.0, %v387_v41 }
 0x156   :  { %v373_v45 = vmax.f32 %v365_v43, 1e-10 }
 0x157   :  { %397 = vst [vmem:[#allocation8 + $0x10] sm:$0xff] %v392_v44  ;;  %v335_v46 = vpop.f32.mrf.mxu2 }
 0x158   :  { %466 = vlog2.f32 %v373_v45 }
 0x15b   :  { %v367_v47 = vpop.f32.mrf.mxu3 }
 0x15c   :  { %v368_v48 = vadd.f32 %v367_v47, %v335_v46 }
 0x15e   :  { %v467_v49 = vpop.eup %466  ;;  %v374_v50 = vmax.f32 %v368_v48, 1e-10 }
 0x15f   :  { %v382_v51 = vmul.f32 0.6931472, %v467_v49 }
 0x160   :  { %468 = vlog2.f32 %v374_v50 }
 0x161   :  { %v388_v52 = vmul.f32 0.4342945, %v382_v51 }
 0x163   :  { %v393_v53 = vmul.f32 10.0, %v388_v52 }
 0x165   :  { %398 = vst [vmem:[#allocation8 + $0x18] sm:$0xff] %v393_v53 }
 0x166   :  { %v469_v54 = vpop.eup %468 }
 0x167   :  { %v384_v55 = vmul.f32 0.6931472, %v469_v54 }
 0x169   :  { %v389_v56 = vmul.f32 0.4342945, %v384_v55 }
 0x16b   :  { %v394_v57 = vmul.f32 10.0, %v389_v56 }
 0x16d   :  { %399 = vst [vmem:[#allocation8 + $0x20] sm:$0xff] %v394_v57 }
 0x16e   :  { %412 = dma.vmem_to_hbm [thread:$0]  %s405_s2, 640, %s407_s5, [#allocation4], %s577_s28, %s577_s28, %s578_s29  }
 0x16f   :  { %570 = dma.done.wait [#allocation4], 640  }
 0x170   :  { %571 = vsyncadd [#allocation4], 4294966656 }
 0x171   :  { %417 = vsyncpa [#allocation3], 1 }
 0x172   :  { %418 = vsyncpa [#allocation6], 1 }
 0x173   :  { %419 = vsyncpa [#allocation4], 1 }

</bundles_post_ra>
